<compile_context>
chip_gen: v6e
topology: v6e:2x2x1
jax: 0.10.0
libtpu: 0.0.40
codegen_flags: <defaults>
</compile_context>

<pallas_src>
import functools

import jax
import jax.numpy as jnp
from jax import lax
from jax.experimental import pallas as pl
from jax.experimental.pallas import tpu as pltpu


def _round_up(x, m):
    return ((x + m - 1) // m) * m


def _cdiv(a, b):
    return (a + b - 1) // b


def _vmem_capacity_bytes():
    try:
        return int(pltpu.get_tpu_info().vmem_capacity_bytes)
    except Exception:
        return 64 * 1024 * 1024  # conservative default (v7x per-TC VMEM)


_SQRT_HALF = 0.7071067811865476


def _gelu(h, approximate):
    if approximate:
        # tanh-based GELU: the transcendental goes to the EUP slot, relieving
        # VALU pressure once the matmuls run at bf16 MXU speed (v6e/v7x).
        return jax.nn.gelu(h, approximate=True)
    # Exact erf GELU — matches torch.nn.GELU() default.
    return 0.5 * h * (1.0 + lax.erf(h * jnp.float32(_SQRT_HALF)))


# ------------------------------ kernels ------------------------------------


def _mlp_kernel_resident(x_ref, w1_ref, b1_ref, w2_ref, b2_ref, o_ref, *,
                         approximate):
    # Weights fit in VMEM: 1-D grid over token tiles; W1/W2 block indices are
    # constant, so the weights are streamed from HBM exactly once.
    h = jnp.dot(x_ref[...], w1_ref[...], preferred_element_type=jnp.float32)
    h = _gelu(h + b1_ref[...], approximate)
    out = jnp.dot(h.astype(w2_ref.dtype), w2_ref[...],
                  preferred_element_type=jnp.float32)
    o_ref[...] = (out + b2_ref[...]).astype(o_ref.dtype)


def _mlp_kernel_ktiled_inplace(x_ref, w1_ref, b1_ref, w2_ref, b2_ref, o_ref, *,
                               approximate):
    # f32 output: accumulate the D reduction directly into the VMEM-resident
    # output block (its index map ignores k) — no separate scratch needed.
    k = pl.program_id(1)
    h = jnp.dot(x_ref[...], w1_ref[...], preferred_element_type=jnp.float32)
    h = _gelu(h + b1_ref[...], approximate)
    part = jnp.dot(h.astype(w2_ref.dtype), w2_ref[...],
                   preferred_element_type=jnp.float32)

    @pl.when(k == 0)
    def _():
        o_ref[...] = part + b2_ref[...]

    @pl.when(k > 0)
    def _():
        o_ref[...] += part


def _mlp_kernel_ktiled_scratch(x_ref, w1_ref, b1_ref, w2_ref, b2_ref, o_ref,
                               acc_ref, *, approximate):
    # Non-f32 output: keep an f32 accumulator scratch resident across k.
    k = pl.program_id(1)
    h = jnp.dot(x_ref[...], w1_ref[...], preferred_element_type=jnp.float32)
    h = _gelu(h + b1_ref[...], approximate)
    part = jnp.dot(h.astype(w2_ref.dtype), w2_ref[...],
                   preferred_element_type=jnp.float32)

    @pl.when(k == 0)
    def _():
        acc_ref[...] = part

    @pl.when(k > 0)
    def _():
        acc_ref[...] += part

    @pl.when(k == pl.num_programs(1) - 1)
    def _():
        o_ref[...] = (acc_ref[...] + b2_ref[...]).astype(o_ref.dtype)


# ------------------------------ wrapper -------------------------------------


@functools.partial(
    jax.jit,
    static_argnames=("tm", "td", "compute_dtype", "approximate_gelu",
                     "weights_resident"))
def mlp_block(x, w1, b1, w2, b2, *, tm=512, td=512,
              compute_dtype=jnp.bfloat16, approximate_gelu=False,
              weights_resident=None):
    """x: (B, S, H). w1: (H, D), b1: (D,), w2: (D, H), b2: (H,).

    compute_dtype: dtype used on the MXU for x/W1/W2 (default bf16);
    accumulation and biases stay f32; output keeps x's original dtype.
    approximate_gelu: use tanh GELU (EUP) instead of exact erf.
    weights_resident: force/disable the weights-in-VMEM path (None = auto).
    """
    B, S, H = x.shape
    D = w1.shape[1]
    M = B * S
    out_dtype = x.dtype

    if compute_dtype is not None:
        x = x.astype(compute_dtype)
        w1 = w1.astype(compute_dtype)
        w2 = w2.astype(compute_dtype)
    b1 = b1.astype(jnp.float32)
    b2 = b2.astype(jnp.float32)

    csz = jnp.dtype(x.dtype).itemsize
    osz = jnp.dtype(out_dtype).itemsize

    # ---- tile sizing (lane-dense: 128-multiples on the last dim) ----
    Hp = _round_up(H, 128)
    Dp0 = _round_up(D, 128)

    tm_eff = min(tm, _round_up(M, 16))
    # Megacore: prefer >=2 token tiles so the "parallel" axis can be sharded
    # across both TensorCores on v7x.
    if _cdiv(M, tm_eff) < 2 and M > 16:
        tm_eff = _round_up(_cdiv(M, 2), 16)
    Mp = _round_up(M, tm_eff)
    n_i = Mp // tm_eff

    # ---- VMEM budget & weights-resident decision ----
    vmem_cap = _vmem_capacity_bytes()
    vmem_limit = min(int(vmem_cap * 0.75), 112 * 1024 * 1024)

    weight_buf_bytes = 2 * 2 * Hp * Dp0 * csz          # W1+W2, double-buffered
    resident_ws = (weight_buf_bytes
                   + 2 * tm_eff * Hp * csz             # x tile, double-buffered
                   + 2 * tm_eff * Hp * osz             # out tile
                   + tm_eff * Dp0 * (4 + csz)          # f32 h + cast copy
                   + 4 * (Dp0 + Hp) * 4)               # biases
    if weights_resident is None:
        weights_resident = (weight_buf_bytes <= vmem_limit // 2
                            and resident_ws <= int(0.8 * vmem_limit))

    if weights_resident:
        td_eff = Dp = Dp0
        n_k = 1
    else:
        # td as a near-divisor of Dp0: keeps zero-padding of D below one
        # (8,128) tile instead of up to a whole td tile.
        n_k = max(1, _cdiv(Dp0, td))
        td_eff = _round_up(_cdiv(Dp0, n_k), 128)
        Dp = td_eff * n_k

    # ---- padding (skipped when already aligned) ----
    # Zero padding is exact: GELU(0)=0, so padded rows/cols contribute 0.
    xf = x.reshape(M, H)
    if (Mp, Hp) != (M, H):
        xf = jnp.pad(xf, ((0, Mp - M), (0, Hp - H)))
    w1p = w1 if (Hp, Dp) == (H, D) else jnp.pad(w1, ((0, Hp - H), (0, Dp - D)))
    w2p = w2 if (Dp, Hp) == (D, H) else jnp.pad(w2, ((0, Dp - D), (0, Hp - H)))
    b1p = (b1 if Dp == D else jnp.pad(b1, ((0, Dp - D),))).reshape(1, Dp)
    b2p = (b2 if Hp == H else jnp.pad(b2, ((0, Hp - H),))).reshape(1, Hp)
    # TODO(synk): for repeated calls, pre-pad/cast the weights once outside the jit.

    # ---- cost estimate (weights re-streamed per token tile unless resident) ----
    w_reads = 1 if weights_resident else n_i
    cost = pl.CostEstimate(
        flops=4 * M * H * D,                  # two matmuls: 2*M*H*D each
        transcendentals=M * D,                # one erf/tanh per hidden activation
        bytes_accessed=(Mp * Hp * csz
                        + w_reads * 2 * Hp * Dp * csz
                        + Mp * Hp * osz),
    )

    if weights_resident:
        kernel = functools.partial(_mlp_kernel_resident,
                                   approximate=approximate_gelu)
        grid = (n_i,)
        in_specs = [
            pl.BlockSpec((tm_eff, Hp), lambda i: (i, 0)),   # x tile
            pl.BlockSpec((Hp, Dp), lambda i: (0, 0)),       # W1 (resident)
            pl.BlockSpec((1, Dp), lambda i: (0, 0)),        # b1
            pl.BlockSpec((Dp, Hp), lambda i: (0, 0)),       # W2 (resident)
            pl.BlockSpec((1, Hp), lambda i: (0, 0)),        # b2
        ]
        out_specs = pl.BlockSpec((tm_eff, Hp), lambda i: (i, 0))
        scratch_shapes = []
        dim_sem = ("parallel",)
    else:
        inplace = jnp.dtype(out_dtype) == jnp.float32
        if inplace:
            kernel = functools.partial(_mlp_kernel_ktiled_inplace,
                                       approximate=approximate_gelu)
            scratch_shapes = []
        else:
            kernel = functools.partial(_mlp_kernel_ktiled_scratch,
                                       approximate=approximate_gelu)
            scratch_shapes = [pltpu.VMEM((tm_eff, Hp), jnp.float32)]
        grid = (n_i, n_k)
        in_specs = [
            pl.BlockSpec((tm_eff, Hp), lambda i, k: (i, 0)),   # x tile
            pl.BlockSpec((Hp, td_eff), lambda i, k: (0, k)),   # W1[:, kTD]
            pl.BlockSpec((1, td_eff), lambda i, k: (0, k)),    # b1[kTD]
            pl.BlockSpec((td_eff, Hp), lambda i, k: (k, 0)),   # W2[kTD, :]
            pl.BlockSpec((1, Hp), lambda i, k: (0, 0)),        # b2
        ]
        out_specs = pl.BlockSpec((tm_eff, Hp), lambda i, k: (i, 0))
        dim_sem = ("parallel", "arbitrary")

    out = pl.pallas_call(
        kernel,
        out_shape=jax.ShapeDtypeStruct((Mp, Hp), out_dtype),
        grid_spec=pltpu.PrefetchScalarGridSpec(
            num_scalar_prefetch=0,
            grid=grid,
            in_specs=in_specs,
            out_specs=out_specs,
            scratch_shapes=scratch_shapes,
        ),
        compiler_params=pltpu.CompilerParams(
            dimension_semantics=dim_sem,
            vmem_limit_bytes=vmem_limit,
        ),
        cost_estimate=cost,
    )(xf, w1p, b1p, w2p, b2p)

    return out[:M, :H].reshape(B, S, H)


# ------------------------------ reference -----------------------------------


def reference_mlp_block(x, w1, b1, w2, b2, *, approximate=False):
    h = jnp.dot(x, w1) + b1
    h = jax.nn.gelu(h, approximate=approximate)
    return jnp.dot(h, w2) + b2


if __name__ == "__main__":
    # Small shapes: batch=2, seq=8, hidden_dim=32, mlp_dim=64
    B, S, H, D = 2, 8, 32, 64

    key = jax.random.PRNGKey(0)
    kx, k1, k2, k3, k4 = jax.random.split(key, 5)

    x = jax.random.normal(kx, (B, S, H), dtype=jnp.float32)
    # PyTorch Linear stores (out, in); we keep the (in, out) transposed
    # weights used directly in the matmuls.
    w1 = jax.random.normal(k1, (H, D), dtype=jnp.float32) * 0.05
    b1 = jax.random.normal(k2, (D,), dtype=jnp.float32) * 0.01
    w2 = jax.random.normal(k3, (D, H), dtype=jnp.float32) * 0.05
    b2 = jax.random.normal(k4, (H,), dtype=jnp.float32) * 0.01

    y_ref = reference_mlp_block(x, w1, b1, w2, b2)

    # 1) Default path: bf16 compute, weights-resident (auto) — loose tol.
    y = mlp_block(x, w1, b1, w2, b2)
    jax.block_until_ready(y)
    assert y.shape == (B, S, H) and y.dtype == x.dtype
    assert jnp.allclose(y, y_ref, atol=2e-2, rtol=2e-2), (
        float(jnp.max(jnp.abs(y - y_ref))))

    # 2) Full-precision resident path — tight tol.
    y32 = mlp_block(x, w1, b1, w2, b2, compute_dtype=jnp.float32)
    jax.block_until_ready(y32)
    assert jnp.allclose(y32, y_ref, atol=1e-5, rtol=1e-5), (
        float(jnp.max(jnp.abs(y32 - y_ref))))

    # 3) Forced k-tiled path, f32 output -> in-place output accumulation.
    y_kt = mlp_block(x, w1, b1, w2, b2, compute_dtype=jnp.float32,
                     weights_resident=False)
    jax.block_until_ready(y_kt)
    assert jnp.allclose(y_kt, y_ref, atol=1e-5, rtol=1e-5), (
        float(jnp.max(jnp.abs(y_kt - y_ref))))

    # 4) Forced k-tiled path, bf16 compute -> f32 scratch accumulator.
    y_kt_bf16 = mlp_block(x, w1, b1, w2, b2, weights_resident=False)
    jax.block_until_ready(y_kt_bf16)
    assert jnp.allclose(y_kt_bf16, y_ref, atol=2e-2, rtol=2e-2), (
        float(jnp.max(jnp.abs(y_kt_bf16 - y_ref))))

    # 5) Multi-step reduction (mlp_dim=256, td=128 -> 2 k-steps), f32.
    D2 = 256
    w1b = jax.random.normal(k1, (H, D2), dtype=jnp.float32) * 0.05
    b1b = jax.random.normal(k2, (D2,), dtype=jnp.float32) * 0.01
    w2b = jax.random.normal(k3, (D2, H), dtype=jnp.float32) * 0.05
    y2_ref = reference_mlp_block(x, w1b, b1b, w2b, b2)
    y2 = mlp_block(x, w1b, b1b, w2b, b2, td=128, compute_dtype=jnp.float32,
                   weights_resident=False)
    jax.block_until_ready(y2)
    assert jnp.allclose(y2, y2_ref, atol=1e-5, rtol=1e-5), (
        float(jnp.max(jnp.abs(y2 - y2_ref))))

    # 6) Optional tanh-approximate GELU (EUP path), f32.
    y_tanh_ref = reference_mlp_block(x, w1, b1, w2, b2, approximate=True)
    y_tanh = mlp_block(x, w1, b1, w2, b2, compute_dtype=jnp.float32,
                       approximate_gelu=True)
    jax.block_until_ready(y_tanh)
    assert jnp.allclose(y_tanh, y_tanh_ref, atol=1e-4, rtol=1e-4), (
        float(jnp.max(jnp.abs(y_tanh - y_tanh_ref))))

    print("KERNEL_OK")
</pallas_src>

<mosaic_0001>
module attributes {stable_mosaic.version = 11 : i64} {
  func.func @_mlp_kernel_resident(%arg0: i32, %arg1: memref<16x128xbf16, #tpu.memory_space<vmem>>, %arg2: memref<128x128xbf16, #tpu.memory_space<vmem>>, %arg3: memref<1x128xf32, #tpu.memory_space<vmem>>, %arg4: memref<128x128xbf16, #tpu.memory_space<vmem>>, %arg5: memref<1x128xf32, #tpu.memory_space<vmem>>, %arg6: memref<16x128xf32, #tpu.memory_space<vmem>>) attributes {dimension_semantics = [#tpu.dimension_semantics<parallel>], iteration_bounds = array<i64: 1>, scalar_prefetch = 0 : i64, scratch_operands = 0 : i64, tpu.core_type = #tpu.core_type<tc>, window_params = [{transform_indices = @transform_0, window_bounds = array<i64: 16, 128>}, {pipeline_mode = #tpu.pipeline_mode<synchronous>, transform_indices = @transform_1, window_bounds = array<i64: 128, 128>}, {pipeline_mode = #tpu.pipeline_mode<synchronous>, transform_indices = @transform_2, window_bounds = array<i64: 1, 128>}, {pipeline_mode = #tpu.pipeline_mode<synchronous>, transform_indices = @transform_3, window_bounds = array<i64: 128, 128>}, {pipeline_mode = #tpu.pipeline_mode<synchronous>, transform_indices = @transform_4, window_bounds = array<i64: 1, 128>}, {transform_indices = @transform_5, window_bounds = array<i64: 16, 128>}]} {
    %c0 = arith.constant 0 : index
    %c0_0 = arith.constant 0 : index
    %0 = vector.load %arg1[%c0, %c0_0] : memref<16x128xbf16, #tpu.memory_space<vmem>>, vector<16x128xbf16>
    %c0_1 = arith.constant 0 : index
    %c0_2 = arith.constant 0 : index
    %1 = vector.load %arg2[%c0_1, %c0_2] : memref<128x128xbf16, #tpu.memory_space<vmem>>, vector<128x128xbf16>
    %cst = arith.constant dense<0.000000e+00> : vector<16x128xf32>
    %2 = tpu.matmul %0, %1, %cst {dimension_numbers = #tpu.dot_dimension_numbers<[1], [0], [0], [1], [0, 0, 1, 1], [], []>} : vector<16x128xbf16>, vector<128x128xbf16>, vector<16x128xf32> -> vector<16x128xf32>
    %c0_3 = arith.constant 0 : index
    %c0_4 = arith.constant 0 : index
    %3 = vector.load %arg3[%c0_3, %c0_4] : memref<1x128xf32, #tpu.memory_space<vmem>>, vector<1x128xf32>
    %4 = vector.broadcast %3 : vector<1x128xf32> to vector<16x128xf32>
    %5 = arith.addf %2, %4 : vector<16x128xf32>
    %cst_5 = arith.constant 5.000000e-01 : f32
    %6 = vector.broadcast %cst_5 : f32 to vector<16x128xf32>
    %7 = arith.mulf %6, %5 : vector<16x128xf32>
    %cst_6 = arith.constant 0.707106769 : f32
    %8 = vector.broadcast %cst_6 : f32 to vector<16x128xf32>
    %9 = arith.mulf %5, %8 : vector<16x128xf32>
    %10 = math.erf %9 : vector<16x128xf32>
    %cst_7 = arith.constant 1.000000e+00 : f32
    %11 = vector.broadcast %cst_7 : f32 to vector<16x128xf32>
    %12 = arith.addf %11, %10 : vector<16x128xf32>
    %13 = arith.mulf %7, %12 : vector<16x128xf32>
    %14 = arith.truncf %13 : vector<16x128xf32> to vector<16x128xbf16>
    %c0_8 = arith.constant 0 : index
    %c0_9 = arith.constant 0 : index
    %15 = vector.load %arg4[%c0_8, %c0_9] : memref<128x128xbf16, #tpu.memory_space<vmem>>, vector<128x128xbf16>
    %cst_10 = arith.constant dense<0.000000e+00> : vector<16x128xf32>
    %16 = tpu.matmul %14, %15, %cst_10 {dimension_numbers = #tpu.dot_dimension_numbers<[1], [0], [0], [1], [0, 0, 1, 1], [], []>} : vector<16x128xbf16>, vector<128x128xbf16>, vector<16x128xf32> -> vector<16x128xf32>
    %c0_11 = arith.constant 0 : index
    %c0_12 = arith.constant 0 : index
    %17 = vector.load %arg5[%c0_11, %c0_12] : memref<1x128xf32, #tpu.memory_space<vmem>>, vector<1x128xf32>
    %18 = vector.broadcast %17 : vector<1x128xf32> to vector<16x128xf32>
    %19 = arith.addf %16, %18 : vector<16x128xf32>
    %c0_13 = arith.constant 0 : index
    %c0_14 = arith.constant 0 : index
    %20 = vector.load %arg6[%c0_13, %c0_14] : memref<16x128xf32, #tpu.memory_space<vmem>>, vector<16x128xf32>
    tpu.vector_store %arg6[%c0_13, %c0_14], %19 {strides = array<i32>} : memref<16x128xf32, #tpu.memory_space<vmem>>, vector<16x128xf32>,
    return
  }
  func.func @transform_0(%arg0: i32) -> (i32, i32) {
    %c0_i32 = arith.constant 0 : i32
    %c0_i32_0 = arith.constant 0 : i32
    return %arg0, %c0_i32 : i32, i32
  }
  func.func @transform_1(%arg0: i32) -> (i32, i32) {
    %c0_i32 = arith.constant 0 : i32
    %c0_i32_0 = arith.constant 0 : i32
    %c0_i32_1 = arith.constant 0 : i32
    return %c0_i32, %c0_i32_0 : i32, i32
  }
  func.func @transform_2(%arg0: i32) -> (i32, i32) {
    %c0_i32 = arith.constant 0 : i32
    %c0_i32_0 = arith.constant 0 : i32
    %c0_i32_1 = arith.constant 0 : i32
    return %c0_i32, %c0_i32_0 : i32, i32
  }
  func.func @transform_3(%arg0: i32) -> (i32, i32) {
    %c0_i32 = arith.constant 0 : i32
    %c0_i32_0 = arith.constant 0 : i32
    %c0_i32_1 = arith.constant 0 : i32
    return %c0_i32, %c0_i32_0 : i32, i32
  }
  func.func @transform_4(%arg0: i32) -> (i32, i32) {
    %c0_i32 = arith.constant 0 : i32
    %c0_i32_0 = arith.constant 0 : i32
    %c0_i32_1 = arith.constant 0 : i32
    return %c0_i32, %c0_i32_0 : i32, i32
  }
  func.func @transform_5(%arg0: i32) -> (i32, i32) {
    %c0_i32 = arith.constant 0 : i32
    %c0_i32_0 = arith.constant 0 : i32
    return %arg0, %c0_i32 : i32, i32
  }
}

</mosaic_0001>

<bundles_post_ra>
// kernel: mlp_block.1
= control target key start
LH: loop header
LB: loop body
LE: loop exit
PB: predicated region body
PF: predicated region fallthrough
CT: control target
= control target key end

     0   :  { %v370_v0 = vmov 0.0   ;;  %vm371_vm0 = vmmov 0   ;;  %s465_s1 = inlined_call_operand.vmem [shape: bf16[128,128], index: 1, kind: input, shape index: {}]   ;;  %s466_s3 = inlined_call_operand.vmem [shape: bf16[128,128], index: 3, kind: input, shape index: {}]   ;;  %s467_s0 = inlined_call_operand.vmem [shape: bf16[16,128], index: 0, kind: input, shape index: {}]   ;;  %s468_s2 = inlined_call_operand.vmem [shape: f32[1,128], index: 2, kind: input, shape index: {}]   ;;  %s469_s4 = inlined_call_operand.vmem [shape: f32[1,128], index: 4, kind: input, shape index: {}]   ;;  %s470_s5 = inlined_call_operand.vmem [shape: f32[16,128], index: 5, kind: output, shape index: {}]  }
   0x1   :  { %307 = vmatprep.subr.bf16.mxu0 %v370_v0  ;;  %v349_v1 = vld [vmem:[%s465_s1 + $0x38] sm:$0xff]   ;;  %323 = vmatprep.mubr.msk.bf16.mxu0 %vm371_vm0, %v370_v0  ;;  %v350_v2 = vld [vmem:[%s465_s1 + $0x30] sm:$0xff]   ;;  %v351_v3 = vld [vmem:[%s465_s1 + $0x28] sm:$0xff]  }
   0x2   :  { %327 = vmatprep.subr.bf16.mxu1 %v370_v0  ;;  %343 = vmatprep.mubr.msk.bf16.mxu1 %vm371_vm0, %v370_v0  ;;  %v358_v4 = vld [vmem:[%s466_s3 + $0x38] sm:$0xff]   ;;  %v352_v5 = vld [vmem:[%s465_s1 + $0x20] sm:$0xff]   ;;  %v354_v7 = vld [vmem:[%s465_s1 + $0x10] sm:$0xff]  }
   0x3   :  { %308 = vmatpush3.bf16.msra.mxu0 %v349_v1  ;;  %328 = vmatpush3.bf16.msra.mxu1 %v358_v4  ;;  %v353_v6 = vld [vmem:[%s465_s1 + $0x18] sm:$0xff]   ;;  %v355_v8 = vld [vmem:[%s465_s1 + $0x8] sm:$0xff]   ;;  %v356_v9 = vld [vmem:[%s465_s1] sm:$0xff]  }
   0x4   :  { %309 = vmatprep.subr.bf16.mxu0 %v370_v0  ;;  %329 = vmatprep.subr.bf16.mxu1 %v370_v0  ;;  %v357_v10 = vld [vmem:[%s467_s0] sm:$0xff]   ;;  %v359_v11 = vld [vmem:[%s466_s3 + $0x30] sm:$0xff]   ;;  %v360_v12 = vld [vmem:[%s466_s3 + $0x28] sm:$0xff]  }
   0x5   :  { %v361_v13 = vld [vmem:[%s466_s3 + $0x20] sm:$0xff]   ;;  %v362_v14 = vld [vmem:[%s466_s3 + $0x18] sm:$0xff]   ;;  %v363_v15 = vld [vmem:[%s466_s3 + $0x10] sm:$0xff]  }
   0x6   :  { %v364_v16 = vld [vmem:[%s466_s3 + $0x8] sm:$0xff]   ;;  %v365_v17 = vld [vmem:[%s466_s3] sm:$0xff]  }
   0x7   :  { %310 = vmatpush3.bf16.msra.mxu0 %v350_v2  ;;  %330 = vmatpush3.bf16.msra.mxu1 %v359_v11  ;;  %v270_v18 = vld [vmem:[%s468_s2] ss:$0 sm:$0xff] }
   0x8   :  { %311 = vmatprep.subr.bf16.mxu0 %v370_v0  ;;  %331 = vmatprep.subr.bf16.mxu1 %v370_v0  ;;  %v280_v36 = vld [vmem:[%s469_s4] ss:$0 sm:$0xff] }
   0xb   :  { %312 = vmatpush3.bf16.msra.mxu0 %v351_v3  ;;  %332 = vmatpush3.bf16.msra.mxu1 %v360_v12 }
   0xc   :  { %313 = vmatprep.subr.bf16.mxu0 %v370_v0  ;;  %333 = vmatprep.subr.bf16.mxu1 %v370_v0 }
   0xf   :  { %314 = vmatpush3.bf16.msra.mxu0 %v352_v5  ;;  %334 = vmatpush3.bf16.msra.mxu1 %v361_v13 }
  0x10   :  { %315 = vmatprep.subr.bf16.mxu0 %v370_v0  ;;  %335 = vmatprep.subr.bf16.mxu1 %v370_v0 }
  0x13   :  { %316 = vmatpush3.bf16.msra.mxu0 %v353_v6  ;;  %336 = vmatpush3.bf16.msra.mxu1 %v362_v14 }
  0x14   :  { %317 = vmatprep.subr.bf16.mxu0 %v370_v0  ;;  %337 = vmatprep.subr.bf16.mxu1 %v370_v0 }
  0x17   :  { %318 = vmatpush3.bf16.msra.mxu0 %v354_v7  ;;  %338 = vmatpush3.bf16.msra.mxu1 %v363_v15 }
  0x18   :  { %319 = vmatprep.subr.bf16.mxu0 %v370_v0  ;;  %339 = vmatprep.subr.bf16.mxu1 %v370_v0 }
  0x1b   :  { %320 = vmatpush3.bf16.msra.mxu0 %v355_v8  ;;  %340 = vmatpush3.bf16.msra.mxu1 %v364_v16 }
  0x1c   :  { %321 = vmatprep.subr.bf16.mxu0 %v370_v0  ;;  %341 = vmatprep.subr.bf16.mxu1 %v370_v0 }
  0x1f   :  { %322 = vmatpush3.bf16.msra.mxu0 %v356_v9  ;;  %342 = vmatpush3.bf16.msra.mxu1 %v365_v17 }
  0x22   :  { %324 = vmatmul.mubr.bf16.vlgmr.msra.gmra.mxu0 %v357_v10 }
  0xe2   :  { %v134_v19 = vpop.f32.mrf.mxu0 }
  0xe3   :  { %v135_v20 = vadd.f32 %v270_v18, %v134_v19 }
  0xe4   :  { %v325_v21 = vpop.f32.mrf.mxu0 }
  0xe5   :  { %v143_v22 = vmul.f32 0.70710677, %v135_v20  ;;  %v141_v30 = vmul.f32 0.5, %v135_v20 }
  0xe6   :  { %v137_v23 = vpop.f32.mrf.mxu0 }
  0xe7   :  { %366 = verf.f32 %v143_v22  ;;  %v138_v24 = vadd.f32 %v270_v18, %v137_v23 }
  0xe8   :  { %v326_v25 = vpop.f32.mrf.mxu0 }
  0xe9   :  { %v144_v26 = vmul.f32 0.70710677, %v138_v24  ;;  %v142_v31 = vmul.f32 0.5, %v138_v24 }
  0xeb   :  { %368 = verf.f32 %v144_v26 }
  0xf4   :  { %v367_v27 = vpop.eup %366 }
  0xf5   :  { %v147_v28 = vadd.f32 1.0, %v367_v27 }
  0xf7   :  { %v149_v33 = vmul.f32 %v147_v28, %v141_v30 }
  0xf8   :  { %v369_v29 = vpop.eup %368 }
  0xf9   :  { %v148_v32 = vadd.f32 1.0, %v369_v29 }
  0xfb   :  { %v150_v34 = vmul.f32 %v148_v32, %v142_v31 }
  0xfd   :  { %v151_v35 = vpack.c.bf16 %v150_v34, %v149_v33 }
  0xff   :  { %344 = vmatmul.mubr.bf16.vlgmr.msra.gmra.mxu1 %v151_v35 }
 0x1bf   :  { %v257_v37 = vpop.f32.mrf.mxu1 }
 0x1c0   :  { %v258_v38 = vadd.f32 %v280_v36, %v257_v37 }
 0x1c1   :  { %v345_v39 = vpop.f32.mrf.mxu1 }
 0x1c2   :  { %264 = vst [vmem:[%s470_s5] sm:$0xff] %v258_v38 }
 0x1c3   :  { %v260_v40 = vpop.f32.mrf.mxu1 }
 0x1c4   :  { %v261_v41 = vadd.f32 %v280_v36, %v260_v40 }
 0x1c5   :  { %v346_v42 = vpop.f32.mrf.mxu1 }
 0x1c6   :  { %265 = vst [vmem:[%s470_s5 + $0x8] sm:$0xff] %v261_v41 }

</bundles_post_ra>
